<compile_context>
chip_gen: v7x
topology: tpu7x:2x2x1
jax: 0.10.0
libtpu: 0.0.40
codegen_flags: <defaults>
</compile_context>

<pallas_src>
import functools

import jax
import jax.numpy as jnp
from jax import lax
from jax.experimental import pallas as pl
from jax.experimental.pallas import tpu as pltpu

LN_EPS = 1e-5                    # torch.nn.LayerNorm default eps
_INV_SQRT2 = 0.7071067811865476


def _gelu_exact(x):
    # torch.nn.functional.gelu default: exact erf-based GELU.
    return 0.5 * x * (1.0 + lax.erf(x * _INV_SQRT2))


def _round_up(x, m):
    return (x + m - 1) // m * m


# --------------------------------------------------------------------------
# Pallas kernels
# --------------------------------------------------------------------------
def _layernorm_rows(z, g, beta):
    # single traversal: sum and sum-of-squares together, var = E[z^2] - mean^2
    inv_h = 1.0 / z.shape[-1]
    mean = jnp.sum(z, axis=-1, keepdims=True) * inv_h
    ex2 = jnp.sum(z * z, axis=-1, keepdims=True) * inv_h
    var = jnp.maximum(ex2 - mean * mean, 0.0)
    return (z - mean) * lax.rsqrt(var + LN_EPS) * g + beta


def _simple_adapter_kernel(x_ref, wd_ref, bd_ref, wu_ref, bu_ref,
                           g_ref, beta_ref, o_ref):
    x = x_ref[...].astype(jnp.float32)                                   # [tm, H] residual path
    h = jnp.dot(x.astype(jnp.bfloat16), wd_ref[...],
                preferred_element_type=jnp.float32) + bd_ref[...]        # [tm, Bp]
    h = _gelu_exact(h)
    y = jnp.dot(h.astype(jnp.bfloat16), wu_ref[...],
                preferred_element_type=jnp.float32) + bu_ref[...]        # [tm, H]
    # dropout: identity at inference time (PyTorch eval semantics)
    z = x + y
    o_ref[...] = _layernorm_rows(z, g_ref[...], beta_ref[...]).astype(o_ref.dtype)


def _mlp_adapter_kernel(x_ref, wd_ref, bd_ref, wm_ref, bm_ref,
                        wu_ref, bu_ref, g_ref, beta_ref, o_ref):
    x = x_ref[...].astype(jnp.float32)
    h = jnp.dot(x.astype(jnp.bfloat16), wd_ref[...],
                preferred_element_type=jnp.float32) + bd_ref[...]
    h = _gelu_exact(h)
    h = jnp.dot(h.astype(jnp.bfloat16), wm_ref[...],
                preferred_element_type=jnp.float32) + bm_ref[...]
    h = _gelu_exact(h)
    y = jnp.dot(h.astype(jnp.bfloat16), wu_ref[...],
                preferred_element_type=jnp.float32) + bu_ref[...]
    z = x + y
    o_ref[...] = _layernorm_rows(z, g_ref[...], beta_ref[...]).astype(o_ref.dtype)


# --------------------------------------------------------------------------
# Generation-aware tiling / VMEM budgeting
# --------------------------------------------------------------------------
@functools.lru_cache(maxsize=None)
def _vmem_budget_bytes():
    cap = 64 << 20                         # conservative fallback: valid everywhere
    try:
        info = pltpu.get_tpu_info()
        cap = int(getattr(info, "vmem_capacity_bytes", cap))
    except Exception:
        pass
    # leave headroom for Mosaic internal scratch / semaphores:
    #   128 MiB (v5e/v6e) -> 112 MiB usable; 64 MiB (v7x per TC) -> 48 MiB usable.
    return max(32 << 20, cap - (16 << 20))


@functools.lru_cache(maxsize=None)
def _num_tc():
    # TensorCores per chip: v7x / v4 / v5p have 2; v5e / v6e have 1.
    try:
        kind = jax.devices()[0].device_kind.lower()
    except Exception:
        return 1
    for tag in ("v7", "v4", "v5p"):
        if tag in kind:
            return 2
    return 1


def _choose_tiling(T, H, Bp, const_bytes, n_mats, max_tm):
    limit = _vmem_budget_bytes()
    # per-row VMEM bytes: double-buffered f32 in+out tiles (16H) + in-kernel
    # f32/bf16 intermediates (~14H) + bottleneck intermediates per extra matmul.
    per_row = 30 * H + 6 * Bp * max(1, n_mats - 1)
    # budget constants at 2x so the double-buffered fallback also fits.
    avail = max(0, limit - 2 * const_bytes - (2 << 20))
    tm = int(min(max_tm, max(8, (avail // per_row) // 8 * 8)))
    if _num_tc() >= 2 and T > 256:
        # 2 TensorCores: make sure both get (balanced) blocks.
        n_blocks = pl.cdiv(T, tm)
        if n_blocks < 2:
            n_blocks = 2
        elif n_blocks % 2:
            n_blocks += 1
        tm = min(tm, max(8, _round_up(pl.cdiv(T, n_blocks), 8)))
    if tm >= T:
        tm = T      # single full-extent block: no 8-row constraint, no partial block
    return tm, pl.cdiv(T, tm), limit


def _const_spec(shape, single_buffer):
    # Grid-invariant operand (weights / biases / LN params): fetched once.
    assert len(shape) == 2
    if single_buffer:
        return pl.BlockSpec(shape, lambda i: (0, 0), pipeline_mode=pl.Buffered(1))
    return pl.BlockSpec(shape, lambda i: (0, 0))


# --------------------------------------------------------------------------
# Wrapper (glue: flatten tokens, pallas_call plumbing — no host pad / slice)
# --------------------------------------------------------------------------
def _run_fused_adapter(kernel, x, consts, *, n_mats, n_gelu, max_tm=4096):
    B, S, H = x.shape
    T = B * S
    Bp = consts[0].shape[1]                                   # padded bottleneck width
    const_bytes = sum(int(c.size) * c.dtype.itemsize for c in consts)
    tm, n_blocks, vmem_limit = _choose_tiling(T, H, Bp, const_bytes, n_mats, max_tm)

    xf = x.reshape(T, H)                                      # free relayout, no copy

    flops = 4 * T * H * Bp + 10 * T * H
    if n_mats == 3:
        flops += 2 * T * Bp * Bp
    cost = pl.CostEstimate(
        flops=int(flops),
        transcendentals=int(n_gelu * T * Bp + T),
        bytes_accessed=int(2 * T * H * x.dtype.itemsize + const_bytes),
    )

    def build(single_buffer_consts):
        const_specs = [_const_spec(c.shape, single_buffer_consts) for c in consts]
        return pl.pallas_call(
            kernel,
            out_shape=jax.ShapeDtypeStruct((T, H), x.dtype),
            grid_spec=pltpu.PrefetchScalarGridSpec(
                num_scalar_prefetch=0,
                grid=(n_blocks,),
                in_specs=[pl.BlockSpec((tm, H), lambda i: (i, 0))] + const_specs,
                out_specs=pl.BlockSpec((tm, H), lambda i: (i, 0)),
            ),
            compiler_params=pltpu.CompilerParams(
                dimension_semantics=("parallel",),
                vmem_limit_bytes=vmem_limit,
            ),
            cost_estimate=cost,
            # input row-block i is fully read before output block i is written.
            input_output_aliases={0: 0},
        )

    try:
        out = build(True)(xf, *consts)
    except Exception:
        # pipeline_mode=pl.Buffered(1) not supported on this jax build:
        # fall back to default double-buffered constants (correct, slightly more VMEM).
        out = build(False)(xf, *consts)
    return out.reshape(B, S, H)


def simple_adapter_forward(x, packed, *, max_tm=4096):
    consts = (packed["wd"], packed["bd"], packed["wu"], packed["bu"],
              packed["g"], packed["beta"])
    return _run_fused_adapter(_simple_adapter_kernel, x, consts,
                              n_mats=2, n_gelu=1, max_tm=max_tm)


def mlp_adapter_forward(x, packed, *, max_tm=4096):
    consts = (packed["wd"], packed["bd"], packed["wm"], packed["bm"],
              packed["wu"], packed["bu"], packed["g"], packed["beta"])
    return _run_fused_adapter(_mlp_adapter_kernel, x, consts,
                              n_mats=3, n_gelu=2, max_tm=max_tm)


# --------------------------------------------------------------------------
# One-time parameter packing: transpose to [in, out], pad bottleneck to x128,
# cast matmul weights to bf16, broadcast biases/LN params to [1, .].
# Padded weight rows/cols and padded biases are zero => output is unchanged.
# --------------------------------------------------------------------------
def pack_simple_adapter_params(p):
    Bn, H = p["down_w"].shape
    # lane-dense output (unmasked vst) requires H % 128 == 0; true for common HF sizes.
    assert H % 128 == 0, f"hidden_size must be a multiple of 128 (got {H})"
    Bp = _round_up(Bn, 128)
    pad = Bp - Bn
    return {
        "wd": jnp.pad(p["down_w"].T, ((0, 0), (0, pad))).astype(jnp.bfloat16),  # [H, Bp]
        "bd": jnp.pad(p["down_b"], (0, pad))[None, :].astype(jnp.float32),      # [1, Bp]
        "wu": jnp.pad(p["up_w"].T, ((0, pad), (0, 0))).astype(jnp.bfloat16),    # [Bp, H]
        "bu": p["up_b"][None, :].astype(jnp.float32),                           # [1, H]
        "g": p["ln_w"][None, :].astype(jnp.float32),
        "beta": p["ln_b"][None, :].astype(jnp.float32),
    }


def pack_mlp_adapter_params(p):
    Bn, H = p["down_w"].shape
    assert H % 128 == 0, f"hidden_size must be a multiple of 128 (got {H})"
    Bp = _round_up(Bn, 128)
    pad = Bp - Bn
    return {
        "wd": jnp.pad(p["down_w"].T, ((0, 0), (0, pad))).astype(jnp.bfloat16),
        "bd": jnp.pad(p["down_b"], (0, pad))[None, :].astype(jnp.float32),
        "wm": jnp.pad(p["mid_w"].T, ((0, pad), (0, pad))).astype(jnp.bfloat16),  # [Bp, Bp]
        "bm": jnp.pad(p["mid_b"], (0, pad))[None, :].astype(jnp.float32),
        "wu": jnp.pad(p["up_w"].T, ((0, pad), (0, 0))).astype(jnp.bfloat16),
        "bu": p["up_b"][None, :].astype(jnp.float32),
        "g": p["ln_w"][None, :].astype(jnp.float32),
        "beta": p["ln_b"][None, :].astype(jnp.float32),
    }


# --------------------------------------------------------------------------
# Deterministic parameter init (matches torch __init__: weights ~ N(0, 1e-3),
# biases = 0, LayerNorm weight = 1 / bias = 0).  Stored torch-style [out, in]
# in f32 — used for the pure-JAX reference; kernels use the packed copies.
# --------------------------------------------------------------------------
def init_simple_adapter(key, hidden_size, bottleneck_size, scale=0.001):
    k1, k2 = jax.random.split(key)
    return {
        "down_w": scale * jax.random.normal(k1, (bottleneck_size, hidden_size), jnp.float32),
        "down_b": jnp.zeros((bottleneck_size,), jnp.float32),
        "up_w": scale * jax.random.normal(k2, (hidden_size, bottleneck_size), jnp.float32),
        "up_b": jnp.zeros((hidden_size,), jnp.float32),
        "ln_w": jnp.ones((hidden_size,), jnp.float32),
        "ln_b": jnp.zeros((hidden_size,), jnp.float32),
    }


def init_mlp_adapter(key, hidden_size, bottleneck_size, scale=0.001):
    k1, k2, k3 = jax.random.split(key, 3)
    return {
        "down_w": scale * jax.random.normal(k1, (bottleneck_size, hidden_size), jnp.float32),
        "down_b": jnp.zeros((bottleneck_size,), jnp.float32),
        "mid_w": scale * jax.random.normal(k2, (bottleneck_size, bottleneck_size), jnp.float32),
        "mid_b": jnp.zeros((bottleneck_size,), jnp.float32),
        "up_w": scale * jax.random.normal(k3, (hidden_size, bottleneck_size), jnp.float32),
        "up_b": jnp.zeros((hidden_size,), jnp.float32),
        "ln_w": jnp.ones((hidden_size,), jnp.float32),
        "ln_b": jnp.zeros((hidden_size,), jnp.float32),
    }


# --------------------------------------------------------------------------
# AdapterWrapper equivalent: hooks adapters onto the per-layer hidden states.
# --------------------------------------------------------------------------
class AdapterWrapperPallas:
    # TODO(synk): the arbitrary HuggingFace base_model (attention blocks, embeddings,
    # loss head) has no clean single-Pallas-kernel equivalent; base layers are modeled
    # as identity pass-throughs so the hook + adapter semantics are exact on the
    # hidden states flowing through each hooked layer.  Training-mode dropout is not
    # implemented (inference identity only).
    def __init__(self, key, num_layers, adapter_locations, adapter_type="simple",
                 hidden_size=128, bottleneck_size=64):
        self.num_layers = num_layers
        self.adapter_locations = list(adapter_locations)
        self.adapter_type = adapter_type
        keys = jax.random.split(key, len(self.adapter_locations))
        if adapter_type == "simple":
            init_fn, pack_fn, self._fwd = (init_simple_adapter,
                                           pack_simple_adapter_params,
                                           simple_adapter_forward)
        elif adapter_type == "mlp":
            init_fn, pack_fn, self._fwd = (init_mlp_adapter,
                                           pack_mlp_adapter_params,
                                           mlp_adapter_forward)
        else:
            raise ValueError(f"Unknown adapter type: {adapter_type}")
        self.adapters = {
            loc: init_fn(k, hidden_size, bottleneck_size)
            for loc, k in zip(self.adapter_locations, keys)
        }
        # Pre-transpose / pad / cast ONCE here (not per forward call).
        self.packed = {loc: pack_fn(p) for loc, p in self.adapters.items()}

    def __call__(self, hidden_states, *, max_tm=4096):
        h = hidden_states
        for i in range(self.num_layers):
            # (frozen base transformer layer would run here; modeled as identity)
            if i in self.adapter_locations:
                h = self._fwd(h, self.packed[i], max_tm=max_tm)
        return h


# --------------------------------------------------------------------------
# Pure-JAX reference for verification
# --------------------------------------------------------------------------
def _ref_layernorm(z, g, b):
    mean = jnp.mean(z, axis=-1, keepdims=True)
    var = jnp.mean(jnp.square(z - mean), axis=-1, keepdims=True)
    return (z - mean) * lax.rsqrt(var + LN_EPS) * g + b


def ref_simple_adapter(x, p):
    h = _gelu_exact(x @ p["down_w"].T + p["down_b"])
    y = h @ p["up_w"].T + p["up_b"]
    return _ref_layernorm(x + y, p["ln_w"], p["ln_b"])


def ref_mlp_adapter(x, p):
    h = _gelu_exact(x @ p["down_w"].T + p["down_b"])
    h = _gelu_exact(h @ p["mid_w"].T + p["mid_b"])
    y = h @ p["up_w"].T + p["up_b"]
    return _ref_layernorm(x + y, p["ln_w"], p["ln_b"])


if __name__ == "__main__":
    key = jax.random.PRNGKey(0)
    k_x, k_simple, k_mlp, k_x2, k_x3 = jax.random.split(key, 5)

    B, S, H, BN = 2, 8, 128, 64
    x = jax.random.normal(k_x, (B, S, H), jnp.float32)

    # --- simple adapters hooked on layers 0 and 1 of a 2-layer (identity) base ---
    wrapper = AdapterWrapperPallas(k_simple, num_layers=2, adapter_locations=[0, 1],
                                   adapter_type="simple", hidden_size=H,
                                   bottleneck_size=BN)
    ref = x
    for loc in wrapper.adapter_locations:
        ref = ref_simple_adapter(ref, wrapper.adapters[loc])
    out = jax.block_until_ready(wrapper(x))
    assert jnp.allclose(out, ref, atol=2e-4, rtol=2e-4), "simple adapter mismatch"

    # --- mlp adapter variant on layer 0 ---
    wrapper_mlp = AdapterWrapperPallas(k_mlp, num_layers=2, adapter_locations=[0],
                                       adapter_type="mlp", hidden_size=H,
                                       bottleneck_size=BN)
    ref_m = ref_mlp_adapter(x, wrapper_mlp.adapters[0])
    out_mlp = jax.block_until_ready(wrapper_mlp(x))
    assert jnp.allclose(out_mlp, ref_m, atol=2e-4, rtol=2e-4), "mlp adapter mismatch"

    # --- ragged token count, single full-extent block (no host pad / slice) ---
    x_odd = jax.random.normal(k_x2, (3, 5, H), jnp.float32)       # T = 15
    ref_odd = ref_simple_adapter(x_odd, wrapper.adapters[0])
    out_odd = jax.block_until_ready(simple_adapter_forward(x_odd, wrapper.packed[0]))
    assert jnp.allclose(out_odd, ref_odd, atol=2e-4, rtol=2e-4), "ragged single-block mismatch"

    # --- ragged token count across multiple blocks (partial last block masked) ---
    x_rag = jax.random.normal(k_x3, (2, 25, H), jnp.float32)      # T = 50, tm = 16
    ref_rag = ref_simple_adapter(x_rag, wrapper.adapters[0])
    out_rag = jax.block_until_ready(
        simple_adapter_forward(x_rag, wrapper.packed[0], max_tm=16))
    assert jnp.allclose(out_rag, ref_rag, atol=2e-4, rtol=2e-4), "ragged multi-block mismatch"

    # --- multi-block pipelined grid (T = 128 rows, tm capped at 32 -> 4 blocks) ---
    x_big = jax.random.normal(k_x, (2, 64, H), jnp.float32)
    ref_big = ref_simple_adapter(x_big, wrapper.adapters[0])
    out_big = jax.block_until_ready(
        simple_adapter_forward(x_big, wrapper.packed[0], max_tm=32))
    assert jnp.allclose(out_big, ref_big, atol=2e-4, rtol=2e-4), "multi-block mismatch"

    # --- bf16 hidden-state I/O (halves HBM traffic; in-kernel math stays f32) ---
    x_bf = x.astype(jnp.bfloat16)
    ref_bf = ref_simple_adapter(x_bf.astype(jnp.float32), wrapper.adapters[0])
    out_bf = jax.block_until_ready(simple_adapter_forward(x_bf, wrapper.packed[0]))
    assert out_bf.dtype == jnp.bfloat16
    assert jnp.allclose(out_bf.astype(jnp.float32), ref_bf, atol=5e-2, rtol=5e-2), \
        "bf16 I/O mismatch"

    print("KERNEL_OK")
</pallas_src>

<mosaic_0001>
module attributes {stable_mosaic.version = 11 : i64} {
  func.func @_simple_adapter_kernel(%arg0: i32, %arg1: memref<16x128xf32, #tpu.memory_space<vmem>>, %arg2: memref<128x128xbf16, #tpu.memory_space<vmem>>, %arg3: memref<1x128xf32, #tpu.memory_space<vmem>>, %arg4: memref<128x128xbf16, #tpu.memory_space<vmem>>, %arg5: memref<1x128xf32, #tpu.memory_space<vmem>>, %arg6: memref<1x128xf32, #tpu.memory_space<vmem>>, %arg7: memref<1x128xf32, #tpu.memory_space<vmem>>, %arg8: memref<16x128xf32, #tpu.memory_space<vmem>>) attributes {dimension_semantics = [#tpu.dimension_semantics<parallel>], iteration_bounds = array<i64: 1>, scalar_prefetch = 0 : i64, scratch_operands = 0 : i64, tpu.core_type = #tpu.core_type<tc>, window_params = [{transform_indices = @transform_0, window_bounds = array<i64: 16, 128>}, {pipeline_mode = #tpu.pipeline_mode<synchronous>, transform_indices = @transform_1, window_bounds = array<i64: 128, 128>}, {pipeline_mode = #tpu.pipeline_mode<synchronous>, transform_indices = @transform_2, window_bounds = array<i64: 1, 128>}, {pipeline_mode = #tpu.pipeline_mode<synchronous>, transform_indices = @transform_3, window_bounds = array<i64: 128, 128>}, {pipeline_mode = #tpu.pipeline_mode<synchronous>, transform_indices = @transform_4, window_bounds = array<i64: 1, 128>}, {pipeline_mode = #tpu.pipeline_mode<synchronous>, transform_indices = @transform_5, window_bounds = array<i64: 1, 128>}, {pipeline_mode = #tpu.pipeline_mode<synchronous>, transform_indices = @transform_6, window_bounds = array<i64: 1, 128>}, {transform_indices = @transform_7, window_bounds = array<i64: 16, 128>}]} {
    %c0 = arith.constant 0 : index
    %c0_0 = arith.constant 0 : index
    %0 = vector.load %arg1[%c0, %c0_0] : memref<16x128xf32, #tpu.memory_space<vmem>>, vector<16x128xf32>
    %1 = arith.truncf %0 : vector<16x128xf32> to vector<16x128xbf16>
    %c0_1 = arith.constant 0 : index
    %c0_2 = arith.constant 0 : index
    %2 = vector.load %arg2[%c0_1, %c0_2] : memref<128x128xbf16, #tpu.memory_space<vmem>>, vector<128x128xbf16>
    %cst = arith.constant dense<0.000000e+00> : vector<16x128xf32>
    %3 = tpu.matmul %1, %2, %cst {dimension_numbers = #tpu.dot_dimension_numbers<[1], [0], [0], [1], [0, 0, 1, 1], [], []>} : vector<16x128xbf16>, vector<128x128xbf16>, vector<16x128xf32> -> vector<16x128xf32>
    %c0_3 = arith.constant 0 : index
    %c0_4 = arith.constant 0 : index
    %4 = vector.load %arg3[%c0_3, %c0_4] : memref<1x128xf32, #tpu.memory_space<vmem>>, vector<1x128xf32>
    %5 = vector.broadcast %4 : vector<1x128xf32> to vector<16x128xf32>
    %6 = arith.addf %3, %5 : vector<16x128xf32>
    %cst_5 = arith.constant 5.000000e-01 : f32
    %7 = vector.broadcast %cst_5 : f32 to vector<16x128xf32>
    %8 = arith.mulf %7, %6 : vector<16x128xf32>
    %cst_6 = arith.constant 0.707106769 : f32
    %9 = vector.broadcast %cst_6 : f32 to vector<16x128xf32>
    %10 = arith.mulf %6, %9 : vector<16x128xf32>
    %11 = math.erf %10 : vector<16x128xf32>
    %cst_7 = arith.constant 1.000000e+00 : f32
    %12 = vector.broadcast %cst_7 : f32 to vector<16x128xf32>
    %13 = arith.addf %12, %11 : vector<16x128xf32>
    %14 = arith.mulf %8, %13 : vector<16x128xf32>
    %15 = arith.truncf %14 : vector<16x128xf32> to vector<16x128xbf16>
    %c0_8 = arith.constant 0 : index
    %c0_9 = arith.constant 0 : index
    %16 = vector.load %arg4[%c0_8, %c0_9] : memref<128x128xbf16, #tpu.memory_space<vmem>>, vector<128x128xbf16>
    %cst_10 = arith.constant dense<0.000000e+00> : vector<16x128xf32>
    %17 = tpu.matmul %15, %16, %cst_10 {dimension_numbers = #tpu.dot_dimension_numbers<[1], [0], [0], [1], [0, 0, 1, 1], [], []>} : vector<16x128xbf16>, vector<128x128xbf16>, vector<16x128xf32> -> vector<16x128xf32>
    %c0_11 = arith.constant 0 : index
    %c0_12 = arith.constant 0 : index
    %18 = vector.load %arg5[%c0_11, %c0_12] : memref<1x128xf32, #tpu.memory_space<vmem>>, vector<1x128xf32>
    %19 = vector.broadcast %18 : vector<1x128xf32> to vector<16x128xf32>
    %20 = arith.addf %17, %19 : vector<16x128xf32>
    %21 = arith.addf %0, %20 : vector<16x128xf32>
    %c0_13 = arith.constant 0 : index
    %c0_14 = arith.constant 0 : index
    %22 = vector.load %arg6[%c0_13, %c0_14] : memref<1x128xf32, #tpu.memory_space<vmem>>, vector<1x128xf32>
    %c0_15 = arith.constant 0 : index
    %c0_16 = arith.constant 0 : index
    %23 = vector.load %arg7[%c0_15, %c0_16] : memref<1x128xf32, #tpu.memory_space<vmem>>, vector<1x128xf32>
    %cst_17 = arith.constant dense<0.000000e+00> : vector<16xf32>
    %24 = vector.multi_reduction <add>, %21, %cst_17 [1] : vector<16x128xf32> to vector<16xf32>
    %25 = vector.shape_cast %24 : vector<16xf32> to vector<16x1xf32>
    %cst_18 = arith.constant 7.812500e-03 : f32
    %26 = vector.broadcast %cst_18 : f32 to vector<16x1xf32>
    %27 = arith.mulf %25, %26 : vector<16x1xf32>
    %28 = arith.mulf %21, %21 : vector<16x128xf32>
    %cst_19 = arith.constant dense<0.000000e+00> : vector<16xf32>
    %29 = vector.multi_reduction <add>, %28, %cst_19 [1] : vector<16x128xf32> to vector<16xf32>
    %30 = vector.shape_cast %29 : vector<16xf32> to vector<16x1xf32>
    %cst_20 = arith.constant 7.812500e-03 : f32
    %31 = vector.broadcast %cst_20 : f32 to vector<16x1xf32>
    %32 = arith.mulf %30, %31 : vector<16x1xf32>
    %33 = arith.mulf %27, %27 : vector<16x1xf32>
    %34 = arith.subf %32, %33 : vector<16x1xf32>
    %cst_21 = arith.constant 0.000000e+00 : f32
    %35 = vector.broadcast %cst_21 : f32 to vector<16x1xf32>
    %36 = arith.maximumf %34, %35 : vector<16x1xf32>
    %37 = vector.broadcast %27 : vector<16x1xf32> to vector<16x128xf32>
    %38 = arith.subf %21, %37 : vector<16x128xf32>
    %cst_22 = arith.constant 9.99999974E-6 : f32
    %39 = vector.broadcast %cst_22 : f32 to vector<16x1xf32>
    %40 = arith.addf %36, %39 : vector<16x1xf32>
    %41 = math.rsqrt %40 : vector<16x1xf32>
    %42 = vector.broadcast %41 : vector<16x1xf32> to vector<16x128xf32>
    %43 = arith.mulf %38, %42 : vector<16x128xf32>
    %44 = vector.broadcast %22 : vector<1x128xf32> to vector<16x128xf32>
    %45 = arith.mulf %43, %44 : vector<16x128xf32>
    %46 = vector.broadcast %23 : vector<1x128xf32> to vector<16x128xf32>
    %47 = arith.addf %45, %46 : vector<16x128xf32>
    %c0_23 = arith.constant 0 : index
    %c0_24 = arith.constant 0 : index
    %48 = vector.load %arg8[%c0_23, %c0_24] : memref<16x128xf32, #tpu.memory_space<vmem>>, vector<16x128xf32>
    tpu.vector_store %arg8[%c0_23, %c0_24], %47 {strides = array<i32>} : memref<16x128xf32, #tpu.memory_space<vmem>>, vector<16x128xf32>,
    return
  }
  func.func @transform_0(%arg0: i32) -> (i32, i32) {
    %c0_i32 = arith.constant 0 : i32
    %c0_i32_0 = arith.constant 0 : i32
    return %arg0, %c0_i32 : i32, i32
  }
  func.func @transform_1(%arg0: i32) -> (i32, i32) {
    %c0_i32 = arith.constant 0 : i32
    %c0_i32_0 = arith.constant 0 : i32
    %c0_i32_1 = arith.constant 0 : i32
    return %c0_i32, %c0_i32_0 : i32, i32
  }
  func.func @transform_2(%arg0: i32) -> (i32, i32) {
    %c0_i32 = arith.constant 0 : i32
    %c0_i32_0 = arith.constant 0 : i32
    %c0_i32_1 = arith.constant 0 : i32
    return %c0_i32, %c0_i32_0 : i32, i32
  }
  func.func @transform_3(%arg0: i32) -> (i32, i32) {
    %c0_i32 = arith.constant 0 : i32
    %c0_i32_0 = arith.constant 0 : i32
    %c0_i32_1 = arith.constant 0 : i32
    return %c0_i32, %c0_i32_0 : i32, i32
  }
  func.func @transform_4(%arg0: i32) -> (i32, i32) {
    %c0_i32 = arith.constant 0 : i32
    %c0_i32_0 = arith.constant 0 : i32
    %c0_i32_1 = arith.constant 0 : i32
    return %c0_i32, %c0_i32_0 : i32, i32
  }
  func.func @transform_5(%arg0: i32) -> (i32, i32) {
    %c0_i32 = arith.constant 0 : i32
    %c0_i32_0 = arith.constant 0 : i32
    %c0_i32_1 = arith.constant 0 : i32
    return %c0_i32, %c0_i32_0 : i32, i32
  }
  func.func @transform_6(%arg0: i32) -> (i32, i32) {
    %c0_i32 = arith.constant 0 : i32
    %c0_i32_0 = arith.constant 0 : i32
    %c0_i32_1 = arith.constant 0 : i32
    return %c0_i32, %c0_i32_0 : i32, i32
  }
  func.func @transform_7(%arg0: i32) -> (i32, i32) {
    %c0_i32 = arith.constant 0 : i32
    %c0_i32_0 = arith.constant 0 : i32
    return %arg0, %c0_i32 : i32, i32
  }
}

module attributes {stable_mosaic.version = 11 : i64} {
  func.func @_simple_adapter_kernel(%arg0: i32, %arg1: memref<16x128xf32, #tpu.memory_space<vmem>>, %arg2: memref<128x128xbf16, #tpu.memory_space<vmem>>, %arg3: memref<1x128xf32, #tpu.memory_space<vmem>>, %arg4: memref<128x128xbf16, #tpu.memory_space<vmem>>, %arg5: memref<1x128xf32, #tpu.memory_space<vmem>>, %arg6: memref<1x128xf32, #tpu.memory_space<vmem>>, %arg7: memref<1x128xf32, #tpu.memory_space<vmem>>, %arg8: memref<16x128xf32, #tpu.memory_space<vmem>>) attributes {dimension_semantics = [#tpu.dimension_semantics<parallel>], iteration_bounds = array<i64: 1>, scalar_prefetch = 0 : i64, scratch_operands = 0 : i64, tpu.core_type = #tpu.core_type<tc>, window_params = [{transform_indices = @transform_0, window_bounds = array<i64: 16, 128>}, {pipeline_mode = #tpu.pipeline_mode<synchronous>, transform_indices = @transform_1, window_bounds = array<i64: 128, 128>}, {pipeline_mode = #tpu.pipeline_mode<synchronous>, transform_indices = @transform_2, window_bounds = array<i64: 1, 128>}, {pipeline_mode = #tpu.pipeline_mode<synchronous>, transform_indices = @transform_3, window_bounds = array<i64: 128, 128>}, {pipeline_mode = #tpu.pipeline_mode<synchronous>, transform_indices = @transform_4, window_bounds = array<i64: 1, 128>}, {pipeline_mode = #tpu.pipeline_mode<synchronous>, transform_indices = @transform_5, window_bounds = array<i64: 1, 128>}, {pipeline_mode = #tpu.pipeline_mode<synchronous>, transform_indices = @transform_6, window_bounds = array<i64: 1, 128>}, {transform_indices = @transform_7, window_bounds = array<i64: 16, 128>}]} {
    %c0 = arith.constant 0 : index
    %c0_0 = arith.constant 0 : index
    %0 = vector.load %arg1[%c0, %c0_0] : memref<16x128xf32, #tpu.memory_space<vmem>>, vector<16x128xf32>
    %1 = arith.truncf %0 : vector<16x128xf32> to vector<16x128xbf16>
    %c0_1 = arith.constant 0 : index
    %c0_2 = arith.constant 0 : index
    %2 = vector.load %arg2[%c0_1, %c0_2] : memref<128x128xbf16, #tpu.memory_space<vmem>>, vector<128x128xbf16>
    %cst = arith.constant dense<0.000000e+00> : vector<16x128xf32>
    %3 = tpu.matmul %1, %2, %cst {dimension_numbers = #tpu.dot_dimension_numbers<[1], [0], [0], [1], [0, 0, 1, 1], [], []>} : vector<16x128xbf16>, vector<128x128xbf16>, vector<16x128xf32> -> vector<16x128xf32>
    %c0_3 = arith.constant 0 : index
    %c0_4 = arith.constant 0 : index
    %4 = vector.load %arg3[%c0_3, %c0_4] : memref<1x128xf32, #tpu.memory_space<vmem>>, vector<1x128xf32>
    %5 = vector.broadcast %4 : vector<1x128xf32> to vector<16x128xf32>
    %6 = arith.addf %3, %5 : vector<16x128xf32>
    %cst_5 = arith.constant 5.000000e-01 : f32
    %7 = vector.broadcast %cst_5 : f32 to vector<16x128xf32>
    %8 = arith.mulf %7, %6 : vector<16x128xf32>
    %cst_6 = arith.constant 0.707106769 : f32
    %9 = vector.broadcast %cst_6 : f32 to vector<16x128xf32>
    %10 = arith.mulf %6, %9 : vector<16x128xf32>
    %11 = math.erf %10 : vector<16x128xf32>
    %cst_7 = arith.constant 1.000000e+00 : f32
    %12 = vector.broadcast %cst_7 : f32 to vector<16x128xf32>
    %13 = arith.addf %12, %11 : vector<16x128xf32>
    %14 = arith.mulf %8, %13 : vector<16x128xf32>
    %15 = arith.truncf %14 : vector<16x128xf32> to vector<16x128xbf16>
    %c0_8 = arith.constant 0 : index
    %c0_9 = arith.constant 0 : index
    %16 = vector.load %arg4[%c0_8, %c0_9] : memref<128x128xbf16, #tpu.memory_space<vmem>>, vector<128x128xbf16>
    %cst_10 = arith.constant dense<0.000000e+00> : vector<16x128xf32>
    %17 = tpu.matmul %15, %16, %cst_10 {dimension_numbers = #tpu.dot_dimension_numbers<[1], [0], [0], [1], [0, 0, 1, 1], [], []>} : vector<16x128xbf16>, vector<128x128xbf16>, vector<16x128xf32> -> vector<16x128xf32>
    %c0_11 = arith.constant 0 : index
    %c0_12 = arith.constant 0 : index
    %18 = vector.load %arg5[%c0_11, %c0_12] : memref<1x128xf32, #tpu.memory_space<vmem>>, vector<1x128xf32>
    %19 = vector.broadcast %18 : vector<1x128xf32> to vector<16x128xf32>
    %20 = arith.addf %17, %19 : vector<16x128xf32>
    %21 = arith.addf %0, %20 : vector<16x128xf32>
    %c0_13 = arith.constant 0 : index
    %c0_14 = arith.constant 0 : index
    %22 = vector.load %arg6[%c0_13, %c0_14] : memref<1x128xf32, #tpu.memory_space<vmem>>, vector<1x128xf32>
    %c0_15 = arith.constant 0 : index
    %c0_16 = arith.constant 0 : index
    %23 = vector.load %arg7[%c0_15, %c0_16] : memref<1x128xf32, #tpu.memory_space<vmem>>, vector<1x128xf32>
    %cst_17 = arith.constant dense<0.000000e+00> : vector<16xf32>
    %24 = vector.multi_reduction <add>, %21, %cst_17 [1] : vector<16x128xf32> to vector<16xf32>
    %25 = vector.shape_cast %24 : vector<16xf32> to vector<16x1xf32>
    %cst_18 = arith.constant 7.812500e-03 : f32
    %26 = vector.broadcast %cst_18 : f32 to vector<16x1xf32>
    %27 = arith.mulf %25, %26 : vector<16x1xf32>
    %28 = arith.mulf %21, %21 : vector<16x128xf32>
    %cst_19 = arith.constant dense<0.000000e+00> : vector<16xf32>
    %29 = vector.multi_reduction <add>, %28, %cst_19 [1] : vector<16x128xf32> to vector<16xf32>
    %30 = vector.shape_cast %29 : vector<16xf32> to vector<16x1xf32>
    %cst_20 = arith.constant 7.812500e-03 : f32
    %31 = vector.broadcast %cst_20 : f32 to vector<16x1xf32>
    %32 = arith.mulf %30, %31 : vector<16x1xf32>
    %33 = arith.mulf %27, %27 : vector<16x1xf32>
    %34 = arith.subf %32, %33 : vector<16x1xf32>
    %cst_21 = arith.constant 0.000000e+00 : f32
    %35 = vector.broadcast %cst_21 : f32 to vector<16x1xf32>
    %36 = arith.maximumf %34, %35 : vector<16x1xf32>
    %37 = vector.broadcast %27 : vector<16x1xf32> to vector<16x128xf32>
    %38 = arith.subf %21, %37 : vector<16x128xf32>
    %cst_22 = arith.constant 9.99999974E-6 : f32
    %39 = vector.broadcast %cst_22 : f32 to vector<16x1xf32>
    %40 = arith.addf %36, %39 : vector<16x1xf32>
    %41 = math.rsqrt %40 : vector<16x1xf32>
    %42 = vector.broadcast %41 : vector<16x1xf32> to vector<16x128xf32>
    %43 = arith.mulf %38, %42 : vector<16x128xf32>
    %44 = vector.broadcast %22 : vector<1x128xf32> to vector<16x128xf32>
    %45 = arith.mulf %43, %44 : vector<16x128xf32>
    %46 = vector.broadcast %23 : vector<1x128xf32> to vector<16x128xf32>
    %47 = arith.addf %45, %46 : vector<16x128xf32>
    %c0_23 = arith.constant 0 : index
    %c0_24 = arith.constant 0 : index
    %48 = vector.load %arg8[%c0_23, %c0_24] : memref<16x128xf32, #tpu.memory_space<vmem>>, vector<16x128xf32>
    tpu.vector_store %arg8[%c0_23, %c0_24], %47 {strides = array<i32>} : memref<16x128xf32, #tpu.memory_space<vmem>>, vector<16x128xf32>,
    return
  }
  func.func @transform_0(%arg0: i32) -> (i32, i32) {
    %c0_i32 = arith.constant 0 : i32
    %c0_i32_0 = arith.constant 0 : i32
    return %arg0, %c0_i32 : i32, i32
  }
  func.func @transform_1(%arg0: i32) -> (i32, i32) {
    %c0_i32 = arith.constant 0 : i32
    %c0_i32_0 = arith.constant 0 : i32
    %c0_i32_1 = arith.constant 0 : i32
    return %c0_i32, %c0_i32_0 : i32, i32
  }
  func.func @transform_2(%arg0: i32) -> (i32, i32) {
    %c0_i32 = arith.constant 0 : i32
    %c0_i32_0 = arith.constant 0 : i32
    %c0_i32_1 = arith.constant 0 : i32
    return %c0_i32, %c0_i32_0 : i32, i32
  }
  func.func @transform_3(%arg0: i32) -> (i32, i32) {
    %c0_i32 = arith.constant 0 : i32
    %c0_i32_0 = arith.constant 0 : i32
    %c0_i32_1 = arith.constant 0 : i32
    return %c0_i32, %c0_i32_0 : i32, i32
  }
  func.func @transform_4(%arg0: i32) -> (i32, i32) {
    %c0_i32 = arith.constant 0 : i32
    %c0_i32_0 = arith.constant 0 : i32
    %c0_i32_1 = arith.constant 0 : i32
    return %c0_i32, %c0_i32_0 : i32, i32
  }
  func.func @transform_5(%arg0: i32) -> (i32, i32) {
    %c0_i32 = arith.constant 0 : i32
    %c0_i32_0 = arith.constant 0 : i32
    %c0_i32_1 = arith.constant 0 : i32
    return %c0_i32, %c0_i32_0 : i32, i32
  }
  func.func @transform_6(%arg0: i32) -> (i32, i32) {
    %c0_i32 = arith.constant 0 : i32
    %c0_i32_0 = arith.constant 0 : i32
    %c0_i32_1 = arith.constant 0 : i32
    return %c0_i32, %c0_i32_0 : i32, i32
  }
  func.func @transform_7(%arg0: i32) -> (i32, i32) {
    %c0_i32 = arith.constant 0 : i32
    %c0_i32_0 = arith.constant 0 : i32
    return %arg0, %c0_i32 : i32, i32
  }
}

</mosaic_0001>

<bundles_post_ra>
// kernel: tpu_custom_call.1
= control target key start
LH: loop header
LB: loop body
LE: loop exit
PB: predicated region body
PF: predicated region fallthrough
CT: control target
= control target key end

     0   :  { %12 = vsyncpa [#allocation3], 0  ;;  %s703_s0 = inlined_call_operand.hbm [shape: f32[16,128], index: 0, kind: input, shape index: {}, may-alias: {0,7}]   ;;  %s704_s1 = inlined_call_operand.hbm [shape: bf16[128,128], index: 1, kind: input, shape index: {}]   ;;  %s705_s2 = inlined_call_operand.vmem [shape: f32[1,128], index: 2, kind: input, shape index: {}]   ;;  %s706_s3 = inlined_call_operand.hbm [shape: bf16[128,128], index: 3, kind: input, shape index: {}]   ;;  %s707_s4 = inlined_call_operand.vmem [shape: f32[1,128], index: 4, kind: input, shape index: {}]   ;;  %s708_s5 = inlined_call_operand.vmem [shape: f32[1,128], index: 5, kind: input, shape index: {}]   ;;  %s709_s6 = inlined_call_operand.vmem [shape: f32[1,128], index: 6, kind: input, shape index: {}]   ;;  %s710_s7 = inlined_call_operand.hbm [shape: f32[16,128], index: 7, kind: output, shape index: {}, may-alias: {0,7}]  }
   0x1   :  { %13 = vsyncpa [#allocation6], 0 }
   0x2   :  { %14 = vsyncpa [#allocation4], 0  ;;  %s581_s24 = smov [#allocation5]   ;;  %s487_s28 = scalar_lea.hbm %s704_s1, 1024 }
   0x3   :  { %s32_s25 = sshll.u32 %s581_s24, 4  ;;  %p488_p0 = scmp.ne.s32.totalorder %s704_s1, %s487_s28  ;;  %s33_s25 = int_to_ptr.vmem [resolvable:$true] %s32_s25 }
   0x4   :  { %p491_p1 = scmp.lt.u32.totalorder %s487_s28, %s704_s1 }
   0x6   :  { %p493_p2 = pnand %p491_p1, %p488_p0 }
   0x8   :  { %496 = shalt.err (!%p493_p2)
}
   0x9   :  { %s497_s10 = scalar_lea.vmem %s33_s25, 1024  ;;  %p502_p4 = scmp.lt.s32.totalorder %s33_s25, %s33_s25 }
   0xa   :  { %p498_p3 = scmp.ne.s32.totalorder %s33_s25, %s497_s10  ;;  %p503_p5 = scmp.lt.s32.totalorder %s497_s10, %s497_s10 }
   0xc   :  { %p504_p6 = por %p503_p5, %p502_p4 }
   0xe   :  { %p505_p7 = pnand %p504_p6, %p498_p3 }
  0x10   :  { %508 = shalt.err (!%p505_p7)
}
  0x11   :  { %s582_s11 = smov 64   ;;  %s583_s12 = smov 4  }
  0x12   :  { %38 = dma.hbm_to_vmem [thread:$0]  %s704_s1, 1024, %s33_s25, [#allocation6], %s582_s11, %s582_s11, %s583_s12  }
  0x13   :  { %s584_s15 = smov [#allocation2]   ;;  %s509_s19 = scalar_lea.hbm %s703_s0, 256 }
  0x14   :  { %s20_s16 = sshll.u32 %s584_s15, 4  ;;  %p510_p8 = scmp.ne.s32.totalorder %s703_s0, %s509_s19  ;;  %s21_s16 = int_to_ptr.vmem [resolvable:$true] %s20_s16 }
  0x15   :  { %p513_p9 = scmp.lt.u32.totalorder %s509_s19, %s703_s0 }
  0x17   :  { %p515_p10 = pnand %p513_p9, %p510_p8 }
  0x19   :  { %518 = shalt.err (!%p515_p10)
}
  0x1a   :  { %s519_s24 = scalar_lea.vmem %s21_s16, 256  ;;  %p524_p12 = scmp.lt.s32.totalorder %s21_s16, %s21_s16 }
  0x1b   :  { %p520_p11 = scmp.ne.s32.totalorder %s21_s16, %s519_s24  ;;  %p525_p13 = scmp.lt.s32.totalorder %s519_s24, %s519_s24 }
  0x1d   :  { %p526_p0 = por %p525_p13, %p524_p12 }
  0x1f   :  { %p527_p1 = pnand %p526_p0, %p520_p11 }
  0x21   :  { %530 = shalt.err (!%p527_p1)
}
  0x22   :  { %s585_s1 = smov 128   ;;  %s586_s25 = smov 8  }
  0x23   :  { %26 = dma.hbm_to_vmem [thread:$0]  %s703_s0, 256, %s21_s16, [#allocation3], %s585_s1, %s585_s1, %s586_s25  }
  0x24   :  { %s587_s28 = smov [#allocation7]   ;;  %s531_s9 = scalar_lea.hbm %s706_s3, 1024 }
  0x25   :  { %s46_s29 = sshll.u32 %s587_s28, 4  ;;  %p532_p2 = scmp.ne.s32.totalorder %s706_s3, %s531_s9  ;;  %s47_s29 = int_to_ptr.vmem [resolvable:$true] %s46_s29 }
  0x26   :  { %p535_p3 = scmp.lt.u32.totalorder %s531_s9, %s706_s3 }
  0x28   :  { %p537_p4 = pnand %p535_p3, %p532_p2 }
  0x2a   :  { %540 = shalt.err (!%p537_p4)
}
  0x2b   :  { %s541_s17 = scalar_lea.vmem %s47_s29, 1024  ;;  %p546_p6 = scmp.lt.s32.totalorder %s47_s29, %s47_s29 }
  0x2c   :  { %p542_p5 = scmp.ne.s32.totalorder %s47_s29, %s541_s17  ;;  %p547_p7 = scmp.lt.s32.totalorder %s541_s17, %s541_s17 }
  0x2e   :  { %p548_p8 = por %p547_p7, %p546_p6 }
  0x30   :  { %p549_p9 = pnand %p548_p8, %p542_p5 }
  0x32   :  { %552 = shalt.err (!%p549_p9)
}
  0x33   :  { %52 = dma.hbm_to_vmem [thread:$0]  %s706_s3, 1024, %s47_s29, [#allocation6], %s582_s11, %s582_s11, %s583_s12  }
  0x34   :  { %575 = dma.done.wait [#allocation3], 256  }
  0x35   :  { %576 = vsyncadd [#allocation3], 4294967040 }
  0x36   :  { %577 = dma.done.wait [#allocation6], 2048  }
  0x37   :  { %578 = vsyncadd [#allocation6], 4294965248  ;;  %v588_v0 = vmov 0.0   ;;  %vm589_vm0 = vmmov 0   ;;  %v463_v1 = vld [vmem:[#allocation5] sm:$0xff]   ;;  %v464_v2 = vld [vmem:[#allocation5 + $0x8] sm:$0xff]  }
  0x38   :  { %413 = vmatprep.subr.bf16.mxu0 %v588_v0  ;;  %429 = vmatprep.mubr.msk.bf16.mxu0 %vm589_vm0, %v588_v0  ;;  %v465_v3 = vld [vmem:[#allocation5 + $0x10] sm:$0xff]   ;;  %v471_v4 = vld [vmem:[#allocation7] sm:$0xff]   ;;  %v466_v5 = vld [vmem:[#allocation5 + $0x18] sm:$0xff]   ;;  %s590_s21 = smov [#allocation8]  }
  0x39   :  { %433 = vmatprep.subr.bf16.mxu1 %v588_v0  ;;  %449 = vmatprep.mubr.msk.bf16.mxu1 %vm589_vm0, %v588_v0  ;;  %v472_v6 = vld [vmem:[#allocation7 + $0x8] sm:$0xff]   ;;  %v467_v7 = vld [vmem:[#allocation5 + $0x20] sm:$0xff]   ;;  %v469_v9 = vld [vmem:[#allocation5 + $0x30] sm:$0xff]   ;;  %s362_s22 = sshll.u32 %s590_s21, 4  ;;  %s363_s22 = int_to_ptr.vmem [resolvable:$true] %s362_s22 }
  0x3a   :  { %414 = vmatpush3.bf16.msra.mxu0 %v463_v1  ;;  %434 = vmatpush3.bf16.msra.mxu1 %v471_v4  ;;  %v468_v8 = vld [vmem:[#allocation5 + $0x28] sm:$0xff]   ;;  %v470_v10 = vld [vmem:[#allocation5 + $0x38] sm:$0xff]   ;;  %v69_v11 = vld [vmem:[#allocation2] sm:$0xff]  ;;  %s553_s23 = scalar_lea.vmem %s363_s22, 256  ;;  %p558_p11 = scmp.lt.s32.totalorder %s363_s22, %s363_s22 }
  0x3b   :  { %415 = vmatprep.subr.bf16.mxu0 %v588_v0  ;;  %435 = vmatprep.subr.bf16.mxu1 %v588_v0  ;;  %v70_v12 = vld [vmem:[#allocation2 + $0x8] sm:$0xff]  ;;  %v473_v14 = vld [vmem:[#allocation7 + $0x10] sm:$0xff]   ;;  %v475_v16 = vld [vmem:[#allocation7 + $0x20] sm:$0xff]   ;;  %p554_p10 = scmp.ne.s32.totalorder %s363_s22, %s553_s23  ;;  %p559_p12 = scmp.lt.s32.totalorder %s553_s23, %s553_s23 }
  0x3c   :  { %v71_v13 = vpack.c.bf16 %v70_v12, %v69_v11  ;;  %v474_v15 = vld [vmem:[#allocation7 + $0x18] sm:$0xff]   ;;  %v476_v17 = vld [vmem:[#allocation7 + $0x28] sm:$0xff]   ;;  %v477_v18 = vld [vmem:[#allocation7 + $0x30] sm:$0xff]  }
  0x3d   :  { %v478_v19 = vld [vmem:[#allocation7 + $0x38] sm:$0xff]   ;;  %v375_v20 = vld [vmem:[%s705_s2] ss:$0 sm:$0xff]  ;;  %p560_p13 = por %p559_p12, %p558_p11 }
  0x3e   :  { %416 = vmatpush3.bf16.msra.mxu0 %v464_v2  ;;  %436 = vmatpush3.bf16.msra.mxu1 %v472_v6  ;;  %v384_v38 = vld [vmem:[%s707_s4] ss:$0 sm:$0xff] }
  0x3f   :  { %417 = vmatprep.subr.bf16.mxu0 %v588_v0  ;;  %437 = vmatprep.subr.bf16.mxu1 %v588_v0  ;;  %p561_p0 = pnand %p560_p13, %p554_p10 }
  0x42   :  { %418 = vmatpush3.bf16.msra.mxu0 %v465_v3  ;;  %438 = vmatpush3.bf16.msra.mxu1 %v473_v14  ;;  %v393_v3 = vld [vmem:[%s708_s5] ss:$0 sm:$0xff] }
  0x43   :  { %419 = vmatprep.subr.bf16.mxu0 %v588_v0  ;;  %439 = vmatprep.subr.bf16.mxu1 %v588_v0 }
  0x46   :  { %420 = vmatpush3.bf16.msra.mxu0 %v466_v5  ;;  %440 = vmatpush3.bf16.msra.mxu1 %v474_v15  ;;  %v394_v5 = vld [vmem:[%s709_s6] ss:$0 sm:$0xff] }
  0x47   :  { %421 = vmatprep.subr.bf16.mxu0 %v588_v0  ;;  %441 = vmatprep.subr.bf16.mxu1 %v588_v0 }
  0x4a   :  { %422 = vmatpush3.bf16.msra.mxu0 %v467_v7  ;;  %442 = vmatpush3.bf16.msra.mxu1 %v475_v16 }
  0x4b   :  { %423 = vmatprep.subr.bf16.mxu0 %v588_v0  ;;  %443 = vmatprep.subr.bf16.mxu1 %v588_v0 }
  0x4e   :  { %424 = vmatpush3.bf16.msra.mxu0 %v468_v8  ;;  %444 = vmatpush3.bf16.msra.mxu1 %v476_v17 }
  0x4f   :  { %425 = vmatprep.subr.bf16.mxu0 %v588_v0  ;;  %445 = vmatprep.subr.bf16.mxu1 %v588_v0 }
  0x52   :  { %426 = vmatpush3.bf16.msra.mxu0 %v469_v9  ;;  %446 = vmatpush3.bf16.msra.mxu1 %v477_v18 }
  0x53   :  { %427 = vmatprep.subr.bf16.mxu0 %v588_v0  ;;  %447 = vmatprep.subr.bf16.mxu1 %v588_v0 }
  0x56   :  { %428 = vmatpush3.bf16.msra.mxu0 %v470_v10  ;;  %448 = vmatpush3.bf16.msra.mxu1 %v478_v19 }
  0x59   :  { %430 = vmatmul.mubr.bf16.vlgmr.msra.gmra.mrb[0].mxu0 %v71_v13 }
 0x12c   :  { %v177_v21 = vpop.f32.mrb[0].mxu0 }
 0x12d   :  { %v178_v22 = vadd.f32 %v375_v20, %v177_v21  ;;  %v431_v23 = vpop.f32.mrb[1].mxu0 }
 0x12e   :  { %v180_v24 = vpop.f32.mrb[2].mxu0 }
 0x12f   :  { %v186_v25 = vmul.f32 0.70710677, %v178_v22  ;;  %v181_v26 = vadd.f32 %v375_v20, %v180_v24  ;;  %v432_v27 = vpop.f32.mrb[3].mxu0  ;;  %v184_v32 = vmul.f32 0.5, %v178_v22 }
 0x131   :  { %479 = verf.f32 %v186_v25  ;;  %v187_v28 = vmul.f32 0.70710677, %v181_v26  ;;  %v185_v33 = vmul.f32 0.5, %v181_v26 }
 0x133   :  { %481 = verf.f32 %v187_v28 }
 0x13b   :  { %v480_v29 = vpop.eup %479 }
 0x13c   :  { %v190_v30 = vadd.f32 1.0, %v480_v29 }
 0x13d   :  { %v482_v31 = vpop.eup %481 }
 0x13e   :  { %v191_v34 = vadd.f32 1.0, %v482_v31  ;;  %v192_v35 = vmul.f32 %v190_v30, %v184_v32 }
 0x140   :  { %v193_v36 = vmul.f32 %v191_v34, %v185_v33 }
 0x142   :  { %v194_v37 = vpack.c.bf16 %v193_v36, %v192_v35 }
 0x144   :  { %450 = vmatmul.mubr.bf16.vlgmr.msra.gmra.mrb[0].mxu1 %v194_v37 }
 0x217   :  { %v300_v39 = vpop.f32.mrb[0].mxu1 }
 0x218   :  { %v301_v40 = vadd.f32 %v384_v38, %v300_v39  ;;  %v451_v41 = vpop.f32.mrb[1].mxu1 }
 0x219   :  { %v303_v42 = vpop.f32.mrb[2].mxu1 }
 0x21a   :  { %v307_v43 = vadd.f32 %v301_v40, %v69_v11  ;;  %v304_v44 = vadd.f32 %v384_v38, %v303_v42  ;;  %v452_v45 = vpop.f32.mrb[3].mxu1 }
 0x21c   :  { %v308_v46 = vadd.f32 %v304_v44, %v70_v12  ;;  %311 = vadd.xlane.f32.xlu0 %v307_v43  ;;  %v317_v47 = vmul.f32 %v307_v43, %v307_v43 }
 0x21e   :  { %319 = vadd.xlane.f32.xlu1 %v317_v47  ;;  %v318_v48 = vmul.f32 %v308_v46, %v308_v46 }
 0x220   :  { %313 = vadd.xlane.f32.xlu0 %v308_v46 }
 0x222   :  { %321 = vadd.xlane.f32.xlu1 %v318_v48 }
 0x2a9   :  { %v312_v49 = vpop.xlane.xlu0 %311 }
 0x2aa   :  { %v315_v50 = vmul.f32 0.0078125, %v312_v49 }
 0x2ab   :  { %v320_v51 = vpop.xlane.xlu1 %319 }
 0x2ac   :  { %v325_v52 = vmul.f32 %v315_v50, %v315_v50  ;;  %v323_v53 = vmul.f32 0.0078125, %v320_v51  ;;  %v331_v1 = vsub.f32 %v307_v43, %v315_v50 }
 0x2ad   :  { %v314_v54 = vpop.xlane.xlu0 %313 }
 0x2ae   :  { %v327_v55 = vsub.f32 %v323_v53, %v325_v52  ;;  %v316_v56 = vmul.f32 0.0078125, %v314_v54 }
 0x2af   :  { %v322_v57 = vpop.xlane.xlu1 %321 }
 0x2b0   :  { %v329_v58 = vmax.f32 %v327_v55, 0.0  ;;  %v326_v59 = vmul.f32 %v316_v56, %v316_v56  ;;  %v324_v60 = vmul.f32 0.0078125, %v322_v57  ;;  %v332_v6 = vsub.f32 %v308_v46, %v316_v56 }
 0x2b2   :  { %v333_v61 = vadd.f32 1e-05, %v329_v58  ;;  %v328_v62 = vsub.f32 %v324_v60, %v326_v59 }
 0x2b4   :  { %483 = vrsqrt.f32 %v333_v61  ;;  %v330_v63 = vmax.f32 %v328_v62, 0.0 }
 0x2b6   :  { %v334_v0 = vadd.f32 1e-05, %v330_v63 }
 0x2b8   :  { %485 = vrsqrt.f32 %v334_v0 }
 0x2be   :  { %v484_v2 = vpop.eup %483 }
 0x2bf   :  { %v337_v4 = vmul.f32 %v484_v2, %v331_v1 }
 0x2c1   :  { %v345_v7 = vmul.f32 %v393_v3, %v337_v4 }
 0x2c2   :  { %v486_v8 = vpop.eup %485 }
 0x2c3   :  { %v338_v9 = vmul.f32 %v486_v8, %v332_v6  ;;  %v353_v10 = vadd.f32 %v394_v5, %v345_v7 }
 0x2c5   :  { %v346_v11 = vmul.f32 %v393_v3, %v338_v9  ;;  %355 = vst [vmem:[#allocation8] sm:$0xff] %v353_v10 }
 0x2c7   :  { %v354_v12 = vadd.f32 %v394_v5, %v346_v11 }
 0x2c9   :  { %356 = vst [vmem:[#allocation8 + $0x8] sm:$0xff] %v354_v12 }
 0x2ca   :  { %564 = shalt.err (!%p561_p0)
}
 0x2cb   :  { %s565_s24 = scalar_lea.hbm %s710_s7, 256 }
 0x2cc   :  { %p566_p1 = scmp.ne.s32.totalorder %s710_s7, %s565_s24  ;;  %p569_p2 = scmp.lt.u32.totalorder %s565_s24, %s710_s7 }
 0x2ce   :  { %p571_p3 = pnand %p569_p2, %p566_p1 }
 0x2d0   :  { %574 = shalt.err (!%p571_p3)
}
 0x2d1   :  { %368 = dma.vmem_to_hbm [thread:$0]  %s363_s22, 256, %s710_s7, [#allocation4], %s585_s1, %s585_s1, %s586_s25  }
 0x2d2   :  { %579 = dma.done.wait [#allocation4], 256  }
 0x2d3   :  { %580 = vsyncadd [#allocation4], 4294967040 }
 0x2d4   :  { %372 = vsyncpa [#allocation3], 1 }
 0x2d5   :  { %373 = vsyncpa [#allocation6], 1 }
 0x2d6   :  { %374 = vsyncpa [#allocation4], 1 }

// kernel: tpu_custom_call.1
= control target key start
LH: loop header
LB: loop body
LE: loop exit
PB: predicated region body
PF: predicated region fallthrough
CT: control target
= control target key end

     0   :  { %12 = vsyncpa [#allocation3], 0  ;;  %s703_s0 = inlined_call_operand.hbm [shape: f32[16,128], index: 0, kind: input, shape index: {}, may-alias: {0,7}]   ;;  %s704_s1 = inlined_call_operand.hbm [shape: bf16[128,128], index: 1, kind: input, shape index: {}]   ;;  %s705_s2 = inlined_call_operand.vmem [shape: f32[1,128], index: 2, kind: input, shape index: {}]   ;;  %s706_s3 = inlined_call_operand.hbm [shape: bf16[128,128], index: 3, kind: input, shape index: {}]   ;;  %s707_s4 = inlined_call_operand.vmem [shape: f32[1,128], index: 4, kind: input, shape index: {}]   ;;  %s708_s5 = inlined_call_operand.vmem [shape: f32[1,128], index: 5, kind: input, shape index: {}]   ;;  %s709_s6 = inlined_call_operand.vmem [shape: f32[1,128], index: 6, kind: input, shape index: {}]   ;;  %s710_s7 = inlined_call_operand.hbm [shape: f32[16,128], index: 7, kind: output, shape index: {}, may-alias: {0,7}]  }
   0x1   :  { %13 = vsyncpa [#allocation6], 0 }
   0x2   :  { %14 = vsyncpa [#allocation4], 0  ;;  %s581_s24 = smov [#allocation5]   ;;  %s487_s28 = scalar_lea.hbm %s704_s1, 1024 }
   0x3   :  { %s32_s25 = sshll.u32 %s581_s24, 4  ;;  %p488_p0 = scmp.ne.s32.totalorder %s704_s1, %s487_s28  ;;  %s33_s25 = int_to_ptr.vmem [resolvable:$true] %s32_s25 }
   0x4   :  { %p491_p1 = scmp.lt.u32.totalorder %s487_s28, %s704_s1 }
   0x6   :  { %p493_p2 = pnand %p491_p1, %p488_p0 }
   0x8   :  { %496 = shalt.err (!%p493_p2)
}
   0x9   :  { %s497_s10 = scalar_lea.vmem %s33_s25, 1024  ;;  %p502_p4 = scmp.lt.s32.totalorder %s33_s25, %s33_s25 }
   0xa   :  { %p498_p3 = scmp.ne.s32.totalorder %s33_s25, %s497_s10  ;;  %p503_p5 = scmp.lt.s32.totalorder %s497_s10, %s497_s10 }
   0xc   :  { %p504_p6 = por %p503_p5, %p502_p4 }
   0xe   :  { %p505_p7 = pnand %p504_p6, %p498_p3 }
  0x10   :  { %508 = shalt.err (!%p505_p7)
}
  0x11   :  { %s582_s11 = smov 64   ;;  %s583_s12 = smov 4  }
  0x12   :  { %38 = dma.hbm_to_vmem [thread:$0]  %s704_s1, 1024, %s33_s25, [#allocation6], %s582_s11, %s582_s11, %s583_s12  }
  0x13   :  { %s584_s15 = smov [#allocation2]   ;;  %s509_s19 = scalar_lea.hbm %s703_s0, 256 }
  0x14   :  { %s20_s16 = sshll.u32 %s584_s15, 4  ;;  %p510_p8 = scmp.ne.s32.totalorder %s703_s0, %s509_s19  ;;  %s21_s16 = int_to_ptr.vmem [resolvable:$true] %s20_s16 }
  0x15   :  { %p513_p9 = scmp.lt.u32.totalorder %s509_s19, %s703_s0 }
  0x17   :  { %p515_p10 = pnand %p513_p9, %p510_p8 }
  0x19   :  { %518 = shalt.err (!%p515_p10)
}
  0x1a   :  { %s519_s24 = scalar_lea.vmem %s21_s16, 256  ;;  %p524_p12 = scmp.lt.s32.totalorder %s21_s16, %s21_s16 }
  0x1b   :  { %p520_p11 = scmp.ne.s32.totalorder %s21_s16, %s519_s24  ;;  %p525_p13 = scmp.lt.s32.totalorder %s519_s24, %s519_s24 }
  0x1d   :  { %p526_p0 = por %p525_p13, %p524_p12 }
  0x1f   :  { %p527_p1 = pnand %p526_p0, %p520_p11 }
  0x21   :  { %530 = shalt.err (!%p527_p1)
}
  0x22   :  { %s585_s1 = smov 128   ;;  %s586_s25 = smov 8  }
  0x23   :  { %26 = dma.hbm_to_vmem [thread:$0]  %s703_s0, 256, %s21_s16, [#allocation3], %s585_s1, %s585_s1, %s586_s25  }
  0x24   :  { %s587_s28 = smov [#allocation7]   ;;  %s531_s9 = scalar_lea.hbm %s706_s3, 1024 }
  0x25   :  { %s46_s29 = sshll.u32 %s587_s28, 4  ;;  %p532_p2 = scmp.ne.s32.totalorder %s706_s3, %s531_s9  ;;  %s47_s29 = int_to_ptr.vmem [resolvable:$true] %s46_s29 }
  0x26   :  { %p535_p3 = scmp.lt.u32.totalorder %s531_s9, %s706_s3 }
  0x28   :  { %p537_p4 = pnand %p535_p3, %p532_p2 }
  0x2a   :  { %540 = shalt.err (!%p537_p4)
}
  0x2b   :  { %s541_s17 = scalar_lea.vmem %s47_s29, 1024  ;;  %p546_p6 = scmp.lt.s32.totalorder %s47_s29, %s47_s29 }
  0x2c   :  { %p542_p5 = scmp.ne.s32.totalorder %s47_s29, %s541_s17  ;;  %p547_p7 = scmp.lt.s32.totalorder %s541_s17, %s541_s17 }
  0x2e   :  { %p548_p8 = por %p547_p7, %p546_p6 }
  0x30   :  { %p549_p9 = pnand %p548_p8, %p542_p5 }
  0x32   :  { %552 = shalt.err (!%p549_p9)
}
  0x33   :  { %52 = dma.hbm_to_vmem [thread:$0]  %s706_s3, 1024, %s47_s29, [#allocation6], %s582_s11, %s582_s11, %s583_s12  }
  0x34   :  { %575 = dma.done.wait [#allocation3], 256  }
  0x35   :  { %576 = vsyncadd [#allocation3], 4294967040 }
  0x36   :  { %577 = dma.done.wait [#allocation6], 2048  }
  0x37   :  { %578 = vsyncadd [#allocation6], 4294965248  ;;  %v588_v0 = vmov 0.0   ;;  %vm589_vm0 = vmmov 0   ;;  %v463_v1 = vld [vmem:[#allocation5] sm:$0xff]   ;;  %v464_v2 = vld [vmem:[#allocation5 + $0x8] sm:$0xff]  }
  0x38   :  { %413 = vmatprep.subr.bf16.mxu0 %v588_v0  ;;  %429 = vmatprep.mubr.msk.bf16.mxu0 %vm589_vm0, %v588_v0  ;;  %v465_v3 = vld [vmem:[#allocation5 + $0x10] sm:$0xff]   ;;  %v471_v4 = vld [vmem:[#allocation7] sm:$0xff]   ;;  %v466_v5 = vld [vmem:[#allocation5 + $0x18] sm:$0xff]   ;;  %s590_s21 = smov [#allocation8]  }
  0x39   :  { %433 = vmatprep.subr.bf16.mxu1 %v588_v0  ;;  %449 = vmatprep.mubr.msk.bf16.mxu1 %vm589_vm0, %v588_v0  ;;  %v472_v6 = vld [vmem:[#allocation7 + $0x8] sm:$0xff]   ;;  %v467_v7 = vld [vmem:[#allocation5 + $0x20] sm:$0xff]   ;;  %v469_v9 = vld [vmem:[#allocation5 + $0x30] sm:$0xff]   ;;  %s362_s22 = sshll.u32 %s590_s21, 4  ;;  %s363_s22 = int_to_ptr.vmem [resolvable:$true] %s362_s22 }
  0x3a   :  { %414 = vmatpush3.bf16.msra.mxu0 %v463_v1  ;;  %434 = vmatpush3.bf16.msra.mxu1 %v471_v4  ;;  %v468_v8 = vld [vmem:[#allocation5 + $0x28] sm:$0xff]   ;;  %v470_v10 = vld [vmem:[#allocation5 + $0x38] sm:$0xff]   ;;  %v69_v11 = vld [vmem:[#allocation2] sm:$0xff]  ;;  %s553_s23 = scalar_lea.vmem %s363_s22, 256  ;;  %p558_p11 = scmp.lt.s32.totalorder %s363_s22, %s363_s22 }
  0x3b   :  { %415 = vmatprep.subr.bf16.mxu0 %v588_v0  ;;  %435 = vmatprep.subr.bf16.mxu1 %v588_v0  ;;  %v70_v12 = vld [vmem:[#allocation2 + $0x8] sm:$0xff]  ;;  %v473_v14 = vld [vmem:[#allocation7 + $0x10] sm:$0xff]   ;;  %v475_v16 = vld [vmem:[#allocation7 + $0x20] sm:$0xff]   ;;  %p554_p10 = scmp.ne.s32.totalorder %s363_s22, %s553_s23  ;;  %p559_p12 = scmp.lt.s32.totalorder %s553_s23, %s553_s23 }
  0x3c   :  { %v71_v13 = vpack.c.bf16 %v70_v12, %v69_v11  ;;  %v474_v15 = vld [vmem:[#allocation7 + $0x18] sm:$0xff]   ;;  %v476_v17 = vld [vmem:[#allocation7 + $0x28] sm:$0xff]   ;;  %v477_v18 = vld [vmem:[#allocation7 + $0x30] sm:$0xff]  }
  0x3d   :  { %v478_v19 = vld [vmem:[#allocation7 + $0x38] sm:$0xff]   ;;  %v375_v20 = vld [vmem:[%s705_s2] ss:$0 sm:$0xff]  ;;  %p560_p13 = por %p559_p12, %p558_p11 }
  0x3e   :  { %416 = vmatpush3.bf16.msra.mxu0 %v464_v2  ;;  %436 = vmatpush3.bf16.msra.mxu1 %v472_v6  ;;  %v384_v38 = vld [vmem:[%s707_s4] ss:$0 sm:$0xff] }
  0x3f   :  { %417 = vmatprep.subr.bf16.mxu0 %v588_v0  ;;  %437 = vmatprep.subr.bf16.mxu1 %v588_v0  ;;  %p561_p0 = pnand %p560_p13, %p554_p10 }
  0x42   :  { %418 = vmatpush3.bf16.msra.mxu0 %v465_v3  ;;  %438 = vmatpush3.bf16.msra.mxu1 %v473_v14  ;;  %v393_v3 = vld [vmem:[%s708_s5] ss:$0 sm:$0xff] }
  0x43   :  { %419 = vmatprep.subr.bf16.mxu0 %v588_v0  ;;  %439 = vmatprep.subr.bf16.mxu1 %v588_v0 }
  0x46   :  { %420 = vmatpush3.bf16.msra.mxu0 %v466_v5  ;;  %440 = vmatpush3.bf16.msra.mxu1 %v474_v15  ;;  %v394_v5 = vld [vmem:[%s709_s6] ss:$0 sm:$0xff] }
  0x47   :  { %421 = vmatprep.subr.bf16.mxu0 %v588_v0  ;;  %441 = vmatprep.subr.bf16.mxu1 %v588_v0 }
  0x4a   :  { %422 = vmatpush3.bf16.msra.mxu0 %v467_v7  ;;  %442 = vmatpush3.bf16.msra.mxu1 %v475_v16 }
  0x4b   :  { %423 = vmatprep.subr.bf16.mxu0 %v588_v0  ;;  %443 = vmatprep.subr.bf16.mxu1 %v588_v0 }
  0x4e   :  { %424 = vmatpush3.bf16.msra.mxu0 %v468_v8  ;;  %444 = vmatpush3.bf16.msra.mxu1 %v476_v17 }
  0x4f   :  { %425 = vmatprep.subr.bf16.mxu0 %v588_v0  ;;  %445 = vmatprep.subr.bf16.mxu1 %v588_v0 }
  0x52   :  { %426 = vmatpush3.bf16.msra.mxu0 %v469_v9  ;;  %446 = vmatpush3.bf16.msra.mxu1 %v477_v18 }
  0x53   :  { %427 = vmatprep.subr.bf16.mxu0 %v588_v0  ;;  %447 = vmatprep.subr.bf16.mxu1 %v588_v0 }
  0x56   :  { %428 = vmatpush3.bf16.msra.mxu0 %v470_v10  ;;  %448 = vmatpush3.bf16.msra.mxu1 %v478_v19 }
  0x59   :  { %430 = vmatmul.mubr.bf16.vlgmr.msra.gmra.mrb[0].mxu0 %v71_v13 }
 0x12c   :  { %v177_v21 = vpop.f32.mrb[0].mxu0 }
 0x12d   :  { %v178_v22 = vadd.f32 %v375_v20, %v177_v21  ;;  %v431_v23 = vpop.f32.mrb[1].mxu0 }
 0x12e   :  { %v180_v24 = vpop.f32.mrb[2].mxu0 }
 0x12f   :  { %v186_v25 = vmul.f32 0.70710677, %v178_v22  ;;  %v181_v26 = vadd.f32 %v375_v20, %v180_v24  ;;  %v432_v27 = vpop.f32.mrb[3].mxu0  ;;  %v184_v32 = vmul.f32 0.5, %v178_v22 }
 0x131   :  { %479 = verf.f32 %v186_v25  ;;  %v187_v28 = vmul.f32 0.70710677, %v181_v26  ;;  %v185_v33 = vmul.f32 0.5, %v181_v26 }
 0x133   :  { %481 = verf.f32 %v187_v28 }
 0x13b   :  { %v480_v29 = vpop.eup %479 }
 0x13c   :  { %v190_v30 = vadd.f32 1.0, %v480_v29 }
 0x13d   :  { %v482_v31 = vpop.eup %481 }
 0x13e   :  { %v191_v34 = vadd.f32 1.0, %v482_v31  ;;  %v192_v35 = vmul.f32 %v190_v30, %v184_v32 }
 0x140   :  { %v193_v36 = vmul.f32 %v191_v34, %v185_v33 }
 0x142   :  { %v194_v37 = vpack.c.bf16 %v193_v36, %v192_v35 }
 0x144   :  { %450 = vmatmul.mubr.bf16.vlgmr.msra.gmra.mrb[0].mxu1 %v194_v37 }
 0x217   :  { %v300_v39 = vpop.f32.mrb[0].mxu1 }
 0x218   :  { %v301_v40 = vadd.f32 %v384_v38, %v300_v39  ;;  %v451_v41 = vpop.f32.mrb[1].mxu1 }
 0x219   :  { %v303_v42 = vpop.f32.mrb[2].mxu1 }
 0x21a   :  { %v307_v43 = vadd.f32 %v301_v40, %v69_v11  ;;  %v304_v44 = vadd.f32 %v384_v38, %v303_v42  ;;  %v452_v45 = vpop.f32.mrb[3].mxu1 }
 0x21c   :  { %v308_v46 = vadd.f32 %v304_v44, %v70_v12  ;;  %311 = vadd.xlane.f32.xlu0 %v307_v43  ;;  %v317_v47 = vmul.f32 %v307_v43, %v307_v43 }
 0x21e   :  { %319 = vadd.xlane.f32.xlu1 %v317_v47  ;;  %v318_v48 = vmul.f32 %v308_v46, %v308_v46 }
 0x220   :  { %313 = vadd.xlane.f32.xlu0 %v308_v46 }
 0x222   :  { %321 = vadd.xlane.f32.xlu1 %v318_v48 }
 0x2a9   :  { %v312_v49 = vpop.xlane.xlu0 %311 }
 0x2aa   :  { %v315_v50 = vmul.f32 0.0078125, %v312_v49 }
 0x2ab   :  { %v320_v51 = vpop.xlane.xlu1 %319 }
 0x2ac   :  { %v325_v52 = vmul.f32 %v315_v50, %v315_v50  ;;  %v323_v53 = vmul.f32 0.0078125, %v320_v51  ;;  %v331_v1 = vsub.f32 %v307_v43, %v315_v50 }
 0x2ad   :  { %v314_v54 = vpop.xlane.xlu0 %313 }
 0x2ae   :  { %v327_v55 = vsub.f32 %v323_v53, %v325_v52  ;;  %v316_v56 = vmul.f32 0.0078125, %v314_v54 }
 0x2af   :  { %v322_v57 = vpop.xlane.xlu1 %321 }
 0x2b0   :  { %v329_v58 = vmax.f32 %v327_v55, 0.0  ;;  %v326_v59 = vmul.f32 %v316_v56, %v316_v56  ;;  %v324_v60 = vmul.f32 0.0078125, %v322_v57  ;;  %v332_v6 = vsub.f32 %v308_v46, %v316_v56 }
 0x2b2   :  { %v333_v61 = vadd.f32 1e-05, %v329_v58  ;;  %v328_v62 = vsub.f32 %v324_v60, %v326_v59 }
 0x2b4   :  { %483 = vrsqrt.f32 %v333_v61  ;;  %v330_v63 = vmax.f32 %v328_v62, 0.0 }
 0x2b6   :  { %v334_v0 = vadd.f32 1e-05, %v330_v63 }
 0x2b8   :  { %485 = vrsqrt.f32 %v334_v0 }
 0x2be   :  { %v484_v2 = vpop.eup %483 }
 0x2bf   :  { %v337_v4 = vmul.f32 %v484_v2, %v331_v1 }
 0x2c1   :  { %v345_v7 = vmul.f32 %v393_v3, %v337_v4 }
 0x2c2   :  { %v486_v8 = vpop.eup %485 }
 0x2c3   :  { %v338_v9 = vmul.f32 %v486_v8, %v332_v6  ;;  %v353_v10 = vadd.f32 %v394_v5, %v345_v7 }
 0x2c5   :  { %v346_v11 = vmul.f32 %v393_v3, %v338_v9  ;;  %355 = vst [vmem:[#allocation8] sm:$0xff] %v353_v10 }
 0x2c7   :  { %v354_v12 = vadd.f32 %v394_v5, %v346_v11 }
 0x2c9   :  { %356 = vst [vmem:[#allocation8 + $0x8] sm:$0xff] %v354_v12 }
 0x2ca   :  { %564 = shalt.err (!%p561_p0)
}
 0x2cb   :  { %s565_s24 = scalar_lea.hbm %s710_s7, 256 }
 0x2cc   :  { %p566_p1 = scmp.ne.s32.totalorder %s710_s7, %s565_s24  ;;  %p569_p2 = scmp.lt.u32.totalorder %s565_s24, %s710_s7 }
 0x2ce   :  { %p571_p3 = pnand %p569_p2, %p566_p1 }
 0x2d0   :  { %574 = shalt.err (!%p571_p3)
}
 0x2d1   :  { %368 = dma.vmem_to_hbm [thread:$0]  %s363_s22, 256, %s710_s7, [#allocation4], %s585_s1, %s585_s1, %s586_s25  }
 0x2d2   :  { %579 = dma.done.wait [#allocation4], 256  }
 0x2d3   :  { %580 = vsyncadd [#allocation4], 4294967040 }
 0x2d4   :  { %372 = vsyncpa [#allocation3], 1 }
 0x2d5   :  { %373 = vsyncpa [#allocation6], 1 }
 0x2d6   :  { %374 = vsyncpa [#allocation4], 1 }

</bundles_post_ra>
